<compile_context>
chip_gen: v6e
topology: v6e:2x2x1
jax: 0.10.0
libtpu: 0.0.40
codegen_flags: <defaults>
</compile_context>

<pallas_src>
import jax
import jax.numpy as jnp
from jax import lax
from jax.experimental import pallas as pl
from jax.experimental.pallas import tpu as pltpu


def _round_up(v, m):
    return ((v + m - 1) // m) * m


def _vmem_capacity_bytes():
    """Physical VMEM per TensorCore; conservative 64 MiB fallback (v7x)."""
    try:
        info = pltpu.get_tpu_info()
        v = getattr(info, "vmem_capacity_bytes", None)
        if v:
            return int(v)
    except Exception:
        pass
    return 64 * 1024 * 1024


def _is_v5():
    try:
        return "v5" in jax.devices()[0].device_kind.lower()
    except Exception:
        return False


def _vmem_bytes(tm, tn, tk, w_bytes):
    """Estimated VMEM working set: double-buffered blocks + f32 accumulator."""
    x_b = tm * tk * 4
    w_b = tn * tk * w_bytes
    m_b = tn * tk * 1
    bias_b = tn * 4
    out_b = tm * tn * 4
    acc_b = tm * tn * 4
    return 2 * (x_b + w_b + m_b + bias_b + out_b) + acc_b


def _pick_tile(dim, cap, align):
    """Largest tile <= cap (multiple of `align`) that divides round_up(dim, align)."""
    padded = _round_up(dim, align)
    if padded <= cap:
        return padded
    t = (cap // align) * align
    while t > align:
        if padded % t == 0:
            return t
        t -= align
    return align


def _select_tiles(B, N, K, w_bytes, budget):
    # tm: largest tile with <= 12.5% padded rows, else minimal-padding tile.
    tm_candidates = [512, 256, 128, 64, 32, 16, 8]
    tm = None
    for c in tm_candidates:
        bp = _round_up(B, c)
        if (bp - B) * 8 <= bp:
            tm = c
            break
    if tm is None:
        tm = min(tm_candidates, key=lambda c: (_round_up(B, c), -c))

    # tn/tk: fattest config whose working set fits the VMEM budget.
    for tn_cap, tk_cap in [(2048, 1024), (1024, 1024), (1024, 512),
                           (512, 512), (512, 256), (256, 256), (128, 256),
                           (128, 128)]:
        tn = _pick_tile(N, tn_cap, 128)
        tk = _pick_tile(K, tk_cap, 128)
        if _vmem_bytes(tm, tn, tk, w_bytes) <= budget:
            return tm, tn, tk
    return tm, 128, 128


def _make_kernel(mask_mul_in_f32: bool):
    def sparse_linear_kernel(x_ref, w_ref, m_ref, b_ref, o_ref, acc_ref):
        """One (tm x tn) output tile; grid axis 2 reduces over K (in_features)."""
        k = pl.program_id(2)

        @pl.when(k == 0)
        def _():
            acc_ref[...] = jnp.zeros_like(acc_ref)

        cdt = w_ref.dtype  # bf16 (default) or f32
        if mask_mul_in_f32 and cdt != jnp.dtype(jnp.float32):
            # v5e: no bf16 VPU ALU -> do the elementwise mask apply in f32 and
            # only cast the dot operand.
            masked_w = (w_ref[...].astype(jnp.float32)
                        * m_ref[...].astype(jnp.float32)).astype(cdt)
        else:
            # Fused sparsity in the operand dtype: int8 mask -> bf16/f32 on the
            # VPU, multiplied straight into the already-bf16 weight tile (no
            # extra (tn,tk) f32->bf16 convert per K step).
            masked_w = w_ref[...] * m_ref[...].astype(cdt)       # (tn, tk)

        x_tile = x_ref[...].astype(cdt)                          # (tm, tk)
        # NT contraction (contract the K axes directly): native MXU form on
        # TPU, no per-tile XLU transpose is emitted for the (tn, tk) operand.
        acc_ref[...] += lax.dot_general(
            x_tile, masked_w,
            dimension_numbers=(((1,), (1,)), ((), ())),          # -> (tm, tn)
            preferred_element_type=jnp.float32)

        @pl.when(k == pl.num_programs(2) - 1)
        def _():
            o_ref[...] = (acc_ref[...] + b_ref[...]).astype(o_ref.dtype)

    return sparse_linear_kernel


def sparse_connected_layer(x, weight, mask, bias, *,
                           tm=None, tn=None, tk=None,
                           use_bf16_matmul=True,
                           vmem_limit_bytes=None):
    B, K = x.shape
    N, K2 = weight.shape
    assert K == K2 and mask.shape == weight.shape and bias.shape == (N,)

    w_dtype = jnp.bfloat16 if use_bf16_matmul else jnp.float32
    w_bytes = 2 if use_bf16_matmul else 4

    # Generation-aware VMEM budget: ~88 MiB tiles on 128 MiB parts (v5e/v6e),
    # ~40 MiB on 64 MiB parts (v7x).
    cap = _vmem_capacity_bytes()
    if vmem_limit_bytes is None:
        vmem_limit_bytes = min(cap * 3 // 4, 96 * 1024 * 1024)
    tile_budget = max(vmem_limit_bytes - 8 * 1024 * 1024, 4 * 1024 * 1024)

    auto_tm, auto_tn, auto_tk = _select_tiles(B, N, K, w_bytes, tile_budget)
    tm = auto_tm if tm is None else tm
    tn = auto_tn if tn is None else tn
    tk = auto_tk if tk is None else tk

    Bp, Np, Kp = _round_up(B, tm), _round_up(N, tn), _round_up(K, tk)

    # Cast first (smaller pads), then pad only when the dims are unaligned.
    # NOTE: mask is assumed to be a binary {0,1} buffer (as in the module);
    # int8 is exact for those values.
    weight = weight.astype(w_dtype)
    mask_i8 = mask.astype(jnp.int8)
    if (Bp, Kp) != (B, K):
        x = jnp.pad(x, ((0, Bp - B), (0, Kp - K)))
    if (Np, Kp) != (N, K):
        weight = jnp.pad(weight, ((0, Np - N), (0, Kp - K)))
        mask_i8 = jnp.pad(mask_i8, ((0, Np - N), (0, Kp - K)))
    bias_p = jnp.pad(bias, (0, Np - N)) if Np != N else bias
    bias2d = bias_p.reshape(1, Np).astype(jnp.float32)

    grid = (Bp // tm, Np // tn, Kp // tk)
    bytes_accessed = (Bp * Kp * 4          # x
                      + Np * Kp * w_bytes  # weight
                      + Np * Kp * 1        # mask (int8)
                      + Np * 4             # bias
                      + Bp * Np * 4)       # output
    cost = pl.CostEstimate(flops=2 * Bp * Np * Kp,
                           transcendentals=0,
                           bytes_accessed=bytes_accessed)

    out = pl.pallas_call(
        _make_kernel(mask_mul_in_f32=_is_v5()),
        out_shape=jax.ShapeDtypeStruct((Bp, Np), x.dtype),
        grid_spec=pltpu.PrefetchScalarGridSpec(
            num_scalar_prefetch=0,
            grid=grid,
            in_specs=[
                pl.BlockSpec((tm, tk), lambda i, j, k: (i, k)),   # x (f32)
                pl.BlockSpec((tn, tk), lambda i, j, k: (j, k)),   # weight (bf16)
                pl.BlockSpec((tn, tk), lambda i, j, k: (j, k)),   # mask (int8)
                pl.BlockSpec((1, tn), lambda i, j, k: (0, j)),    # bias row (f32)
            ],
            out_specs=pl.BlockSpec((tm, tn), lambda i, j, k: (i, j)),
            scratch_shapes=[pltpu.VMEM((tm, tn), jnp.float32)],
        ),
        compiler_params=pltpu.CompilerParams(
            dimension_semantics=("parallel", "parallel", "arbitrary"),
            vmem_limit_bytes=int(vmem_limit_bytes)),
        cost_estimate=cost,
    )(x, weight, mask_i8, bias2d)

    return out[:B, :N]


if __name__ == "__main__":
    key = jax.random.PRNGKey(0)
    key_a, key_b = jax.random.split(key)

    def make_inputs(k, B, in_features, out_features, sparsity=0.5):
        kx, kw, km = jax.random.split(k, 3)
        x = jax.random.normal(kx, (B, in_features), dtype=jnp.float32)
        # kaiming_normal_(weight, a=0, nonlinearity='relu'), mode='fan_in':
        # std = sqrt(2 / fan_in) with fan_in = in_features.
        std = (2.0 / in_features) ** 0.5
        w = std * jax.random.normal(kw, (out_features, in_features), dtype=jnp.float32)
        m = (jax.random.uniform(km, (out_features, in_features)) > sparsity).astype(jnp.float32)
        b = jnp.zeros((out_features,), dtype=jnp.float32)
        return x, w, m, b

    def ref_f32(x, w, m, b):
        return x @ (w * m).T + b

    def ref_bf16_operands(x, w, m, b):
        # Same operand rounding as the kernel's default path (f32 accumulation).
        xb = x.astype(jnp.bfloat16).astype(jnp.float32)
        wb = (w * m).astype(jnp.bfloat16).astype(jnp.float32)
        return xb @ wb.T + b

    ok = True

    # Case 1: unaligned shapes -> padding path + automatic tile selection
    # (default bf16-operand path).
    x, w, m, b = make_inputs(key_a, B=6, in_features=200, out_features=100)
    y = jax.block_until_ready(sparse_connected_layer(x, w, m, b))
    ok &= y.shape == (6, 100)
    ok &= bool(jnp.allclose(y, ref_bf16_operands(x, w, m, b), atol=2e-3, rtol=2e-3))
    ok &= bool(jnp.allclose(y, ref_f32(x, w, m, b), atol=5e-2, rtol=5e-2))

    # Case 2: aligned shapes, forced small tiles -> multi-block K reduction
    # (accumulator init/finalize) and multiple N tiles, bf16 path.
    x, w, m, b = make_inputs(key_b, B=8, in_features=384, out_features=256)
    y = jax.block_until_ready(
        sparse_connected_layer(x, w, m, b, tm=8, tn=128, tk=128))
    ok &= bool(jnp.allclose(y, ref_bf16_operands(x, w, m, b), atol=2e-3, rtol=2e-3))

    # Case 3: full-precision path (use_bf16_matmul=False) stays bit-tight.
    y = jax.block_until_ready(
        sparse_connected_layer(x, w, m, b, use_bf16_matmul=False))
    ok &= bool(jnp.allclose(y, ref_f32(x, w, m, b), atol=1e-4, rtol=1e-4))

    if ok:
        print("KERNEL_OK")
    else:
        raise SystemExit("mismatch vs pure-JAX reference")
</pallas_src>

<mosaic_0001>
module attributes {stable_mosaic.version = 11 : i64} {
  func.func @sparse_linear_kernel(%arg0: i32, %arg1: i32, %arg2: i32, %arg3: memref<8x256xf32, #tpu.memory_space<vmem>>, %arg4: memref<128x256xbf16, #tpu.memory_space<vmem>>, %arg5: memref<128x256xi8, #tpu.memory_space<vmem>>, %arg6: memref<1x128xf32, #tpu.memory_space<vmem>>, %arg7: memref<8x128xf32, #tpu.memory_space<vmem>>, %arg8: memref<8x128xf32, #tpu.memory_space<vmem>>) attributes {dimension_semantics = [#tpu.dimension_semantics<parallel>, #tpu.dimension_semantics<parallel>, #tpu.dimension_semantics<arbitrary>], iteration_bounds = array<i64: 1, 1, 1>, scalar_prefetch = 0 : i64, scratch_operands = 1 : i64, tpu.core_type = #tpu.core_type<tc>, window_params = [{transform_indices = @transform_0, window_bounds = array<i64: 8, 256>}, {transform_indices = @transform_1, window_bounds = array<i64: 128, 256>}, {transform_indices = @transform_2, window_bounds = array<i64: 128, 256>}, {transform_indices = @transform_3, window_bounds = array<i64: 1, 128>}, {transform_indices = @transform_4, window_bounds = array<i64: 8, 128>}]} {
    %c0_i32 = arith.constant 0 : i32
    %0 = arith.cmpi eq, %arg2, %c0_i32 : i32
    %1 = arith.extui %0 : i1 to i32
    %c0_i32_0 = arith.constant 0 : i32
    %2 = arith.cmpi ne, %1, %c0_i32_0 : i32
    scf.if %2 {
      %cst_12 = arith.constant 0.000000e+00 : f32
      %16 = vector.broadcast %cst_12 : f32 to vector<8x128xf32>
      %c0_13 = arith.constant 0 : index
      %c0_14 = arith.constant 0 : index
      %17 = vector.load %arg8[%c0_13, %c0_14] : memref<8x128xf32, #tpu.memory_space<vmem>>, vector<8x128xf32>
      tpu.vector_store %arg8[%c0_13, %c0_14], %16 {strides = array<i32>} : memref<8x128xf32, #tpu.memory_space<vmem>>, vector<8x128xf32>,
    } else {
    }
    %c0 = arith.constant 0 : index
    %c0_1 = arith.constant 0 : index
    %3 = vector.load %arg4[%c0, %c0_1] : memref<128x256xbf16, #tpu.memory_space<vmem>>, vector<128x256xbf16>
    %c0_2 = arith.constant 0 : index
    %c0_3 = arith.constant 0 : index
    %4 = vector.load %arg5[%c0_2, %c0_3] : memref<128x256xi8, #tpu.memory_space<vmem>>, vector<128x256xi8>
    %5 = arith.sitofp %4 : vector<128x256xi8> to vector<128x256xbf16>
    %6 = arith.mulf %3, %5 : vector<128x256xbf16>
    %c0_4 = arith.constant 0 : index
    %c0_5 = arith.constant 0 : index
    %7 = vector.load %arg3[%c0_4, %c0_5] : memref<8x256xf32, #tpu.memory_space<vmem>>, vector<8x256xf32>
    %8 = arith.truncf %7 : vector<8x256xf32> to vector<8x256xbf16>
    %c0_6 = arith.constant 0 : index
    %c0_7 = arith.constant 0 : index
    %9 = vector.load %arg8[%c0_6, %c0_7] : memref<8x128xf32, #tpu.memory_space<vmem>>, vector<8x128xf32>
    %cst = arith.constant dense<0.000000e+00> : vector<8x128xf32>
    %10 = tpu.matmul %8, %6, %cst {dimension_numbers = #tpu.dot_dimension_numbers<[1], [1], [0], [0], [0, 0, 1, 0], [], []>} : vector<8x256xbf16>, vector<128x256xbf16>, vector<8x128xf32> -> vector<8x128xf32>
    %11 = arith.addf %9, %10 : vector<8x128xf32>
    %c0_8 = arith.constant 0 : index
    %c0_9 = arith.constant 0 : index
    %12 = vector.load %arg8[%c0_8, %c0_9] : memref<8x128xf32, #tpu.memory_space<vmem>>, vector<8x128xf32>
    tpu.vector_store %arg8[%c0_8, %c0_9], %11 {strides = array<i32>} : memref<8x128xf32, #tpu.memory_space<vmem>>, vector<8x128xf32>,
    %c0_i32_10 = arith.constant 0 : i32
    %13 = arith.cmpi eq, %arg2, %c0_i32_10 : i32
    %14 = arith.extui %13 : i1 to i32
    %c0_i32_11 = arith.constant 0 : i32
    %15 = arith.cmpi ne, %14, %c0_i32_11 : i32
    scf.if %15 {
      %c0_12 = arith.constant 0 : index
      %c0_13 = arith.constant 0 : index
      %16 = vector.load %arg8[%c0_12, %c0_13] : memref<8x128xf32, #tpu.memory_space<vmem>>, vector<8x128xf32>
      %c0_14 = arith.constant 0 : index
      %c0_15 = arith.constant 0 : index
      %17 = vector.load %arg6[%c0_14, %c0_15] : memref<1x128xf32, #tpu.memory_space<vmem>>, vector<1x128xf32>
      %18 = vector.broadcast %17 : vector<1x128xf32> to vector<8x128xf32>
      %19 = arith.addf %16, %18 : vector<8x128xf32>
      %c0_16 = arith.constant 0 : index
      %c0_17 = arith.constant 0 : index
      %20 = vector.load %arg7[%c0_16, %c0_17] : memref<8x128xf32, #tpu.memory_space<vmem>>, vector<8x128xf32>
      tpu.vector_store %arg7[%c0_16, %c0_17], %19 {strides = array<i32>} : memref<8x128xf32, #tpu.memory_space<vmem>>, vector<8x128xf32>,
    } else {
    }
    return
  }
  func.func @transform_0(%arg0: i32, %arg1: i32, %arg2: i32) -> (i32, i32) {
    %c0_i32 = arith.constant 0 : i32
    return %arg0, %arg2 : i32, i32
  }
  func.func @transform_1(%arg0: i32, %arg1: i32, %arg2: i32) -> (i32, i32) {
    %c0_i32 = arith.constant 0 : i32
    return %arg1, %arg2 : i32, i32
  }
  func.func @transform_2(%arg0: i32, %arg1: i32, %arg2: i32) -> (i32, i32) {
    %c0_i32 = arith.constant 0 : i32
    return %arg1, %arg2 : i32, i32
  }
  func.func @transform_3(%arg0: i32, %arg1: i32, %arg2: i32) -> (i32, i32) {
    %c0_i32 = arith.constant 0 : i32
    %c0_i32_0 = arith.constant 0 : i32
    return %c0_i32, %arg1 : i32, i32
  }
  func.func @transform_4(%arg0: i32, %arg1: i32, %arg2: i32) -> (i32, i32) {
    %c0_i32 = arith.constant 0 : i32
    return %arg0, %arg1 : i32, i32
  }
}

</mosaic_0001>

<bundles_post_ra>
// kernel: tpu_custom_call.1
= control target key start
LH: loop header
LB: loop body
LE: loop exit
PB: predicated region body
PF: predicated region fallthrough
CT: control target
= control target key end

     0   :  { %9 = vsyncpa [#allocation4], 0  ;;  %s530_s0 = inlined_call_operand.hbm [shape: f32[8,256], index: 0, kind: input, shape index: {}]   ;;  %s531_s1 = inlined_call_operand.hbm [shape: bf16[128,256], index: 1, kind: input, shape index: {}]   ;;  %s532_s2 = inlined_call_operand.hbm [shape: s8[128,256], index: 2, kind: input, shape index: {}]   ;;  %s533_s3 = inlined_call_operand.vmem [shape: f32[1,128], index: 3, kind: input, shape index: {}]   ;;  %s534_s4 = inlined_call_operand.hbm [shape: f32[8,128], index: 4, kind: output, shape index: {}]  }
   0x1   :  { %10 = vsyncpa [#allocation7], 0 }
   0x2   :  { %11 = vsyncpa [#allocation5], 0  ;;  %s482_s15 = smov [#allocation6]  }
   0x3   :  { %s27_s16 = sshll.u32 %s482_s15, 4  ;;  %s28_s16 = int_to_ptr.vmem [resolvable:$true] %s27_s16 }
   0x4   :  { %s404_s17 = scalar_lea.vmem %s28_s16, 2048  ;;  %p409_p1 = scmp.lt.s32.totalorder %s28_s16, %s28_s16 }
   0x5   :  { %p405_p0 = scmp.ne.s32.totalorder %s28_s16, %s404_s17  ;;  %p410_p2 = scmp.lt.s32.totalorder %s404_s17, %s404_s17 }
   0x7   :  { %p411_p3 = por %p410_p2, %p409_p1 }
   0x9   :  { %p412_p4 = pnand %p411_p3, %p405_p0 }
   0xb   :  { %415 = shalt.err (!%p412_p4)
}
   0xc   :  { %s483_s18 = smov 128   ;;  %s484_s19 = smov 8  }
   0xd   :  { %33 = dma.hbm_to_vmem [thread:$0]  %s531_s1, 2048, %s28_s16, [#allocation7], %s483_s18, %s483_s18, %s484_s19  }
   0xe   :  { %s485_s22 = smov [#allocation3]   ;;  %s486_s24 = smov [#allocation8]  }
   0xf   :  { %s18_s23 = sshll.u32 %s485_s22, 4  ;;  %s39_s25 = sshll.u32 %s486_s24, 4  ;;  %s19_s23 = int_to_ptr.vmem [resolvable:$true] %s18_s23  ;;  %s40_s25 = int_to_ptr.vmem [resolvable:$true] %s39_s25 }
  0x10   :  { %s424_s26 = scalar_lea.vmem %s19_s23, 256  ;;  %p429_p6 = scmp.lt.s32.totalorder %s19_s23, %s19_s23 }
  0x11   :  { %p425_p5 = scmp.ne.s32.totalorder %s19_s23, %s424_s26  ;;  %p430_p7 = scmp.lt.s32.totalorder %s424_s26, %s424_s26 }
  0x13   :  { %p431_p8 = por %p430_p7, %p429_p6 }
  0x15   :  { %p432_p9 = pnand %p431_p8, %p425_p5 }
  0x17   :  { %435 = shalt.err (!%p432_p9)
}
  0x18   :  { %21 = dma.hbm_to_vmem [thread:$0]  %s530_s0, 256, %s19_s23, [#allocation4]  }
  0x19   :  { %s444_s29 = scalar_lea.vmem %s40_s25, 1024  ;;  %p449_p11 = scmp.lt.s32.totalorder %s40_s25, %s40_s25 }
  0x1a   :  { %p445_p10 = scmp.ne.s32.totalorder %s40_s25, %s444_s29  ;;  %p450_p12 = scmp.lt.s32.totalorder %s444_s29, %s444_s29 }
  0x1c   :  { %p451_p13 = por %p450_p12, %p449_p11 }
  0x1e   :  { %p452_p0 = pnand %p451_p13, %p445_p10 }
  0x20   :  { %455 = shalt.err (!%p452_p0)
}
  0x21   :  { %s487_s1 = smov 256   ;;  %s488_s30 = smov 16  }
  0x22   :  { %45 = dma.hbm_to_vmem [thread:$0]  %s532_s2, 1024, %s40_s25, [#allocation7], %s487_s1, %s487_s1, %s488_s30  }
  0x23   :  { %476 = dma.done.wait [#allocation4], 256  }
  0x24   :  { %477 = vsyncadd [#allocation4], 4294967040 }
  0x25   :  { %478 = dma.done.wait [#allocation7], 3072  }
  0x26   :  { %479 = vsyncadd [#allocation7], 4294964224  ;;  %v85_v0 = vld [vmem:[#allocation8 + $0x30] sm:$0xff]  ;;  %v86_v1 = vld [vmem:[#allocation8 + $0x38] sm:$0xff]  ;;  %s489_s7 = smov [#allocation9]  }
  0x27   :  { %v99_v2 = vunpack.c.l.s8.bf16 %v85_v0  ;;  %v101_v3 = vunpack.c.h.s8.bf16 %v85_v0  ;;  %v77_v4 = vld [vmem:[#allocation6 + $0x70] sm:$0xff]  ;;  %v78_v5 = vld [vmem:[#allocation6 + $0x78] sm:$0xff]  ;;  %v100_v6 = vunpack.c.l.s8.bf16 %v86_v1  ;;  %v102_v7 = vunpack.c.h.s8.bf16 %v86_v1  ;;  %v83_v8 = vld [vmem:[#allocation8 + $0x20] sm:$0xff]  ;;  %s345_s8 = sshll.u32 %s489_s7, 4  ;;  %s346_s8 = int_to_ptr.vmem [resolvable:$true] %s345_s8 }
  0x28   :  { %v75_v9 = vld [vmem:[#allocation6 + $0x60] sm:$0xff]  ;;  %v76_v10 = vld [vmem:[#allocation6 + $0x68] sm:$0xff]  ;;  %v97_v12 = vunpack.c.h.s8.bf16 %v83_v8  ;;  %v73_v27 = vld [vmem:[#allocation6 + $0x50] sm:$0xff]  ;;  %v95_v31 = vunpack.c.l.s8.bf16 %v83_v8  ;;  %s456_s9 = scalar_lea.vmem %s346_s8, 128  ;;  %p461_p2 = scmp.lt.s32.totalorder %s346_s8, %s346_s8 }
  0x29   :  { %v84_v11 = vld [vmem:[#allocation8 + $0x28] sm:$0xff]  ;;  %v369_v13 = vcombine.low %v101_v3, %v102_v7  ;;  %v370_v14 = vcombine.high %v101_v3, %v102_v7  ;;  %v367_v15 = vcombine.low %v99_v2, %v100_v6  ;;  %v368_v16 = vcombine.high %v99_v2, %v100_v6  ;;  %v74_v28 = vld [vmem:[#allocation6 + $0x58] sm:$0xff]  ;;  %v71_v36 = vld [vmem:[#allocation6 + $0x40] sm:$0xff]  ;;  %p457_p1 = scmp.ne.s32.totalorder %s346_s8, %s456_s9  ;;  %p462_p3 = scmp.lt.s32.totalorder %s456_s9, %s456_s9 }
  0x2a   :  { %v98_v17 = vunpack.c.h.s8.bf16 %v84_v11  ;;  %v96_v32 = vunpack.c.l.s8.bf16 %v84_v11  ;;  %v200_v34 = vld [vmem:[#allocation3 + $0x8] sm:$0xff]  ;;  %v72_v39 = vld [vmem:[#allocation6 + $0x48] sm:$0xff]  ;;  %v81_v40 = vld [vmem:[#allocation8 + $0x10] sm:$0xff] }
  0x2b   :  { %v197_v18 = vmul.bf16 %v369_v13, %v77_v4  ;;  %v198_v19 = vmul.bf16 %v370_v14, %v78_v5  ;;  %v195_v20 = vmul.bf16 %v367_v15, %v75_v9  ;;  %v196_v21 = vmul.bf16 %v368_v16, %v76_v10  ;;  %v82_v41 = vld [vmem:[#allocation8 + $0x18] sm:$0xff]  ;;  %v69_v51 = vld [vmem:[#allocation6 + $0x30] sm:$0xff]  ;;  %v67_v59 = vld [vmem:[#allocation6 + $0x20] sm:$0xff]  ;;  %p463_p4 = por %p462_p3, %p461_p2 }
  0x2c   :  { %v365_v22 = vcombine.low %v97_v12, %v98_v17  ;;  %v366_v26 = vcombine.high %v97_v12, %v98_v17  ;;  %v363_v37 = vcombine.low %v95_v31, %v96_v32  ;;  %v364_v38 = vcombine.high %v95_v31, %v96_v32  ;;  %v70_v52 = vld [vmem:[#allocation6 + $0x38] sm:$0xff]  ;;  %v68_v62 = vld [vmem:[#allocation6 + $0x28] sm:$0xff]  ;;  %v79_v63 = vld [vmem:[#allocation8] sm:$0xff] }
  0x2d   :  { %v386_v23 = vcombine.high %v197_v18, %v198_v19  ;;  %v385_v24 = vcombine.low %v197_v18, %v198_v19  ;;  %v384_v25 = vcombine.high %v195_v20, %v196_v21  ;;  %v383_v33 = vcombine.low %v195_v20, %v196_v21  ;;  %v80_v0 = vld [vmem:[#allocation8 + $0x8] sm:$0xff]  ;;  %v65_v9 = vld [vmem:[#allocation6 + $0x10] sm:$0xff]  ;;  %v66_v10 = vld [vmem:[#allocation6 + $0x18] sm:$0xff]  ;;  %p464_p5 = pnand %p463_p4, %p457_p1 }
  0x2e   :  { %v193_v29 = vmul.bf16 %v365_v22, %v73_v27  ;;  %v194_v30 = vmul.bf16 %v366_v26, %v74_v28  ;;  %v202_v42 = vpack.c.bf16 %v200_v34, %v200_v34  ;;  %v191_v43 = vmul.bf16 %v363_v37, %v71_v36  ;;  %v63_v19 = vld [vmem:[#allocation6] sm:$0xff]  ;;  %v64_v20 = vld [vmem:[#allocation6 + $0x8] sm:$0xff]  ;;  %v199_v26 = vld [vmem:[#allocation3] sm:$0xff] }
  0x2f   :  { %284 = vmatprep.subr.bf16.mxu0 %v386_v23  ;;  %v192_v44 = vmul.bf16 %v364_v38, %v72_v39  ;;  %v93_v45 = vunpack.c.h.s8.bf16 %v81_v40  ;;  %v94_v46 = vunpack.c.h.s8.bf16 %v82_v41  ;;  %v91_v55 = vunpack.c.l.s8.bf16 %v81_v40  ;;  %v387_v28 = vld [vmem:[%s533_s3] ss:$0 sm:$0xff] }
  0x30   :  { %285 = vmatpush1.bf16.xpose.msra.mxu0 %v385_v24  ;;  %v382_v35 = vcombine.high %v193_v29, %v194_v30  ;;  %316 = vmatprep.mubr.bf16.mxu0 %v202_v42  ;;  %v381_v47 = vcombine.low %v193_v29, %v194_v30  ;;  %v92_v56 = vunpack.c.l.s8.bf16 %v82_v41  ;;  %v89_v3 = vunpack.c.h.s8.bf16 %v79_v63 }
  0x31   :  { %286 = vmatprep.subr.bf16.mxu0 %v384_v25  ;;  %v380_v48 = vcombine.high %v191_v43, %v192_v44  ;;  %v361_v49 = vcombine.low %v93_v45, %v94_v46  ;;  %v362_v50 = vcombine.high %v93_v45, %v94_v46  ;;  %v379_v57 = vcombine.low %v191_v43, %v192_v44 }
  0x32   :  { %v359_v60 = vcombine.low %v91_v55, %v92_v56  ;;  %v360_v61 = vcombine.high %v91_v55, %v92_v56  ;;  %v90_v4 = vunpack.c.h.s8.bf16 %v80_v0  ;;  %v87_v13 = vunpack.c.l.s8.bf16 %v79_v63 }
  0x33   :  { %v189_v53 = vmul.bf16 %v361_v49, %v69_v51  ;;  %v190_v54 = vmul.bf16 %v362_v50, %v70_v52  ;;  %v88_v14 = vunpack.c.l.s8.bf16 %v80_v0  ;;  %v201_v27 = vpack.c.bf16 %v199_v26, %v199_v26 }
  0x34   :  { %v187_v1 = vmul.bf16 %v359_v60, %v67_v59  ;;  %v188_v2 = vmul.bf16 %v360_v61, %v68_v62  ;;  %v357_v7 = vcombine.low %v89_v3, %v90_v4  ;;  %v358_v8 = vcombine.high %v89_v3, %v90_v4 }
  0x35   :  { %v378_v58 = vcombine.high %v189_v53, %v190_v54  ;;  %v377_v5 = vcombine.low %v189_v53, %v190_v54  ;;  %v355_v17 = vcombine.low %v87_v13, %v88_v14  ;;  %v356_v18 = vcombine.high %v87_v13, %v88_v14 }
  0x36   :  { %v376_v6 = vcombine.high %v187_v1, %v188_v2  ;;  %v185_v11 = vmul.bf16 %v357_v7, %v65_v9  ;;  %v186_v12 = vmul.bf16 %v358_v8, %v66_v10  ;;  %v375_v15 = vcombine.low %v187_v1, %v188_v2 }
  0x37   :  { %v183_v21 = vmul.bf16 %v355_v17, %v63_v19  ;;  %v184_v22 = vmul.bf16 %v356_v18, %v64_v20 }
  0x38   :  { %287 = vmatpush1.bf16.xpose.msra.mxu0 %v383_v33  ;;  %v374_v16 = vcombine.high %v185_v11, %v186_v12  ;;  %v373_v23 = vcombine.low %v185_v11, %v186_v12 }
  0x39   :  { %288 = vmatprep.subr.bf16.mxu0 %v382_v35  ;;  %v372_v24 = vcombine.high %v183_v21, %v184_v22  ;;  %v371_v25 = vcombine.low %v183_v21, %v184_v22 }
  0x40   :  { %289 = vmatpush1.bf16.xpose.msra.mxu0 %v381_v47 }
  0x41   :  { %290 = vmatprep.subr.bf16.mxu0 %v380_v48 }
  0x48   :  { %291 = vmatpush1.bf16.xpose.msra.mxu0 %v379_v57 }
  0x49   :  { %292 = vmatprep.subr.bf16.mxu0 %v378_v58 }
  0x50   :  { %293 = vmatpush1.bf16.xpose.msra.mxu0 %v377_v5 }
  0x51   :  { %294 = vmatprep.subr.bf16.mxu0 %v376_v6 }
  0x58   :  { %295 = vmatpush1.bf16.xpose.msra.mxu0 %v375_v15 }
  0x59   :  { %296 = vmatprep.subr.bf16.mxu0 %v374_v16 }
  0x60   :  { %297 = vmatpush1.bf16.xpose.msra.mxu0 %v373_v23 }
  0x61   :  { %298 = vmatprep.subr.bf16.mxu0 %v372_v24 }
  0x68   :  { %299 = vmatpush1.bf16.xpose.msra.mxu0 %v371_v25 }
  0x6f   :  { %317 = vmatmul.mubr.bf16.vlgmr.msra.gmra.mxu0 %v201_v27 }
 0x12f   :  { %v318_v29 = vpop.f32.mrf.mxu0 }
 0x130   :  { %v337_v30 = vadd.f32 %v387_v28, %v318_v29 }
 0x131   :  { %v320_v31 = vpop.f32.mrf.mxu0 }
 0x132   :  { %338 = vst [vmem:[#allocation9] sm:$0xff] %v337_v30 }
 0x133   :  { %v321_v32 = vpop.f32.mrf.mxu0 }
 0x134   :  { %467 = shalt.err (!%p464_p5)
}
 0x135   :  { %348 = dma.vmem_to_hbm [thread:$0]  %s346_s8, 128, %s534_s4, [#allocation5]   ;;  %v322_v33 = vpop.f32.mrf.mxu0 }
 0x136   :  { %480 = dma.done.wait [#allocation5], 128  }
 0x137   :  { %481 = vsyncadd [#allocation5], 4294967168 }
 0x138   :  { %352 = vsyncpa [#allocation4], 1 }
 0x139   :  { %353 = vsyncpa [#allocation7], 1 }
 0x13a   :  { %354 = vsyncpa [#allocation5], 1 }

</bundles_post_ra>
